<compile_context>
chip_gen: v6e
topology: v6e:2x2x1
jax: 0.10.0
libtpu: 0.0.40
codegen_flags: <defaults>
</compile_context>

<pallas_src>
import functools

import jax
import jax.numpy as jnp
import numpy as np
from jax.experimental import pallas as pl
from jax.experimental.pallas import tpu as pltpu


def _dice_kernel(x_ref, t_ref, w_ref, w2_ref, out_ref, *, rem, masked):
    """Accumulate sum(p*onehot*w^2) and sum(p*w) for one (batch, spatial tile)."""
    j = pl.program_id(1)
    nt = pl.num_programs(1)

    @pl.when(j == 0)
    def _init():
        out_ref[...] = jnp.zeros_like(out_ref)

    def accumulate(tail):
        x = x_ref[0].astype(jnp.float32)      # (C, T) logits for this tile
        t = t_ref[0].astype(jnp.int32)        # (1, T) class ids
        C, T = x.shape

        # numerically stable softmax over the class (sublane) axis
        m = jnp.max(x, axis=0, keepdims=True)
        e = jnp.exp(x - m)
        inv = pl.reciprocal(jnp.sum(e, axis=0, keepdims=True), approx=False)
        p = e * inv                           # (C, T)

        cls = jax.lax.broadcasted_iota(jnp.int32, (C, T), 0)
        eq = cls == t                         # fused one-hot predicate

        if tail:
            # last tile only: mask columns beyond the true spatial extent.
            # Selects (not multiplies) so NaN/Inf garbage in the partial block
            # tail cannot leak into the sums.
            col = jax.lax.broadcasted_iota(jnp.int32, (1, T), 1)
            valid = col < rem
            eq = jnp.logical_and(eq, valid)
            p_sum = jnp.where(valid, p, 0.0)
        else:
            p_sum = p

        # reduce over the spatial tile first (per-class partial sums) ...
        s_p = jnp.sum(p_sum, axis=1, keepdims=True)                   # (C, 1)
        s_i = jnp.sum(jnp.where(eq, p, 0.0), axis=1, keepdims=True)   # (C, 1)

        # ... then apply the (precomputed) class weights on tiny (C,1) vectors.
        inter = jnp.sum(s_i * w2_ref[...])    # sum_c w_c^2 * sum_hw p*onehot
        sump = jnp.sum(s_p * w_ref[...])      # sum_c w_c   * sum_hw p

        # single full-block, lane-dense accumulate (rows 0/1 hold the sums)
        row = jax.lax.broadcasted_iota(jnp.int32, (8, 128), 0)
        vals = jnp.where(row == 0, inter, jnp.where(row == 1, sump, 0.0))
        out_ref[0] = out_ref[0] + vals

    if masked:
        @pl.when(j < nt - 1)
        def _full_tiles():
            accumulate(False)

        @pl.when(j == nt - 1)
        def _tail_tile():
            accumulate(True)
    else:
        accumulate(False)


def multiclass_batch_dice_loss(output, target, weights=None, *, max_tile_elems=None):
    """Pallas implementation of MultiClassBatchDiceLoss.forward."""
    N, C, H, W = output.shape
    HW = H * W

    x = output.reshape(N, C, HW)                       # keep caller dtype (bf16 ok)
    t_dtype = jnp.int8 if C <= 127 else jnp.int32      # shrink target HBM stream
    t = target.reshape(N, 1, HW).astype(t_dtype)

    if weights is None:
        w = jnp.full((C,), 1.0 / (C - 1), dtype=jnp.float32).at[0].set(0.0)
    else:
        w = jnp.asarray(weights, jnp.float32).reshape(C)
    w_col = w.reshape(C, 1)
    w2_col = (w * w).reshape(C, 1)

    # sum(onehot * w) == sum over pixels of w[target]: tiny gather+reduce in
    # plain JAX on the original (unpadded) target, removing work from the kernel.
    sum_o = jnp.sum(jnp.take(w, target.reshape(-1).astype(jnp.int32)))

    # ---- spatial tile sizing (generation aware, itemsize aware) ----
    try:
        vmem_cap = int(pltpu.get_tpu_info().vmem_capacity_bytes)
    except Exception:
        vmem_cap = 64 * 1024 * 1024            # conservative (v7x per-TC VMEM)
    itemsize = x.dtype.itemsize
    if max_tile_elems is None:
        blk_budget = min(8 * 1024 * 1024, vmem_cap // 8)   # ~8 MiB logits block
        cap = max(128, (blk_budget // (C * itemsize)) // 128 * 128)
    else:
        cap = max(128, (int(max_tile_elems) // 128) * 128)

    if HW <= cap:
        T = HW                     # single full-extent block (no mask needed)
        num_tiles = 1
        masked = False
    else:
        T = cap                    # multiple of 128 lanes
        num_tiles = int(pl.cdiv(HW, T))
        masked = (num_tiles * T != HW)
    rem = HW - (num_tiles - 1) * T   # valid columns in the last tile

    logits_blk = C * T * itemsize
    tgt_blk = T * jnp.dtype(t_dtype).itemsize
    est = 2 * (logits_blk + tgt_blk) + (4 << 20)           # double buffers + slack
    vmem_limit = int(min(vmem_cap // 2, max(est, 32 << 20)))

    kernel = functools.partial(_dice_kernel, rem=rem, masked=masked)

    partials = pl.pallas_call(
        kernel,
        out_shape=jax.ShapeDtypeStruct((N, 8, 128), jnp.float32),
        grid_spec=pltpu.PrefetchScalarGridSpec(
            num_scalar_prefetch=0,
            grid=(N, num_tiles),
            in_specs=[
                pl.BlockSpec((1, C, T), lambda b, j: (b, 0, j)),   # logits tile
                pl.BlockSpec((1, 1, T), lambda b, j: (b, 0, j)),   # target tile
                pl.BlockSpec((C, 1), lambda b, j: (0, 0)),         # w   (shared)
                pl.BlockSpec((C, 1), lambda b, j: (0, 0)),         # w^2 (shared)
            ],
            out_specs=pl.BlockSpec((1, 8, 128), lambda b, j: (b, 0, 0)),
        ),
        compiler_params=pltpu.CompilerParams(
            dimension_semantics=("parallel", "arbitrary"),
            vmem_limit_bytes=vmem_limit),
    )(x, t, w_col, w2_col)

    inter_total = jnp.sum(partials[:, 0, 0])   # sum_b sum_hw w^2 * p * onehot
    sum_p_total = jnp.sum(partials[:, 1, 0])   # sum_b sum_hw w   * p
    smooth = 1e-10
    return 1.0 - 2.0 * inter_total / (sum_p_total + sum_o + smooth)


def _reference_loss(output, target, weights=None):
    """Pure-JAX reference matching the PyTorch module exactly."""
    N, C = output.shape[0], output.shape[1]
    p = jax.nn.softmax(output, axis=1)
    onehot = jax.nn.one_hot(target, C, axis=1, dtype=output.dtype)
    if weights is None:
        w = jnp.full((1, C), 1.0 / (C - 1), dtype=output.dtype).at[0, 0].set(0.0)
    else:
        w = jnp.asarray(weights, output.dtype)
    w = w[:, :, None]
    of = p.reshape(N, C, -1) * w
    tf = onehot.reshape(N, C, -1) * w
    inter = of * tf
    return 1.0 - 2.0 * inter.sum() / (of.sum() + tf.sum() + 1e-10)


if __name__ == "__main__":
    key = jax.random.PRNGKey(0)
    k1, k2 = jax.random.split(key)

    # case 1: default weights, HW a multiple of 128 (single tile, no mask path)
    N, C, H, W = 2, 4, 16, 16
    logits = jax.random.normal(k1, (N, C, H, W), dtype=jnp.float32)
    target = jax.random.randint(k2, (N, H, W), 0, C, dtype=jnp.int32)

    loss = jax.block_until_ready(multiclass_batch_dice_loss(logits, target))
    ref = jax.block_until_ready(_reference_loss(logits, target))
    np.testing.assert_allclose(np.asarray(loss), np.asarray(ref), rtol=1e-5, atol=1e-5)

    # case 2: explicit weights, odd C and ragged spatial size
    k3, k4 = jax.random.split(k2)
    N2, C2, H2, W2 = 2, 5, 17, 19
    logits2 = jax.random.normal(k3, (N2, C2, H2, W2), dtype=jnp.float32)
    target2 = jax.random.randint(k4, (N2, H2, W2), 0, C2, dtype=jnp.int32)
    wts = jnp.array([[0.0, 0.5, 0.25, 0.25, 1.0]], dtype=jnp.float32)
    ref2 = jax.block_until_ready(_reference_loss(logits2, target2, wts))

    # 2a: default tiling -> single full-extent (non-128-multiple) block
    loss2a = jax.block_until_ready(multiclass_batch_dice_loss(logits2, target2, wts))
    np.testing.assert_allclose(np.asarray(loss2a), np.asarray(ref2), rtol=1e-5, atol=1e-5)

    # 2b: forced small tiles -> multi-tile accumulation + masked partial tail block
    loss2b = jax.block_until_ready(
        multiclass_batch_dice_loss(logits2, target2, wts, max_tile_elems=128))
    np.testing.assert_allclose(np.asarray(loss2b), np.asarray(ref2), rtol=1e-5, atol=1e-5)

    print("KERNEL_OK")
</pallas_src>

<mosaic_0001>
module attributes {stable_mosaic.version = 11 : i64} {
  func.func @_dice_kernel(%arg0: i32, %arg1: i32, %arg2: memref<1x4x256xf32, #tpu.memory_space<vmem>>, %arg3: memref<1x1x256xi8, #tpu.memory_space<vmem>>, %arg4: memref<4x1xf32, #tpu.memory_space<vmem>>, %arg5: memref<4x1xf32, #tpu.memory_space<vmem>>, %arg6: memref<1x8x128xf32, #tpu.memory_space<vmem>>) attributes {dimension_semantics = [#tpu.dimension_semantics<parallel>, #tpu.dimension_semantics<arbitrary>], iteration_bounds = array<i64: 2, 1>, scalar_prefetch = 0 : i64, scratch_operands = 0 : i64, tpu.core_type = #tpu.core_type<tc>, window_params = [{transform_indices = @transform_0, window_bounds = array<i64: 1, 4, 256>}, {transform_indices = @transform_1, window_bounds = array<i64: 1, 1, 256>}, {pipeline_mode = #tpu.pipeline_mode<synchronous>, transform_indices = @transform_2, window_bounds = array<i64: 4, 1>}, {pipeline_mode = #tpu.pipeline_mode<synchronous>, transform_indices = @transform_3, window_bounds = array<i64: 4, 1>}, {transform_indices = @transform_4, window_bounds = array<i64: 1, 8, 128>}]} {
    %c0_i32 = arith.constant 0 : i32
    %0 = arith.cmpi eq, %arg1, %c0_i32 : i32
    %1 = arith.extui %0 : i1 to i32
    %c0_i32_0 = arith.constant 0 : i32
    %2 = arith.cmpi ne, %1, %c0_i32_0 : i32
    scf.if %2 {
      %cst_24 = arith.constant 0.000000e+00 : f32
      %55 = vector.broadcast %cst_24 : f32 to vector<1x8x128xf32>
      %c0_25 = arith.constant 0 : index
      %c0_26 = arith.constant 0 : index
      %c0_27 = arith.constant 0 : index
      %56 = vector.load %arg6[%c0_25, %c0_26, %c0_27] : memref<1x8x128xf32, #tpu.memory_space<vmem>>, vector<1x8x128xf32>
      tpu.vector_store %arg6[%c0_25, %c0_26, %c0_27], %55 {strides = array<i32>} : memref<1x8x128xf32, #tpu.memory_space<vmem>>, vector<1x8x128xf32>,
    } else {
    }
    %c0 = arith.constant 0 : index
    %c0_1 = arith.constant 0 : index
    %c0_2 = arith.constant 0 : index
    %3 = vector.load %arg2[%c0, %c0_1, %c0_2] : memref<1x4x256xf32, #tpu.memory_space<vmem>>, vector<1x4x256xf32>
    %4 = vector.shape_cast %3 : vector<1x4x256xf32> to vector<4x256xf32>
    %c0_3 = arith.constant 0 : index
    %c0_4 = arith.constant 0 : index
    %c0_5 = arith.constant 0 : index
    %5 = vector.load %arg3[%c0_3, %c0_4, %c0_5] : memref<1x1x256xi8, #tpu.memory_space<vmem>>, vector<1x1x256xi8>
    %6 = vector.shape_cast %5 : vector<1x1x256xi8> to vector<1x256xi8>
    %7 = arith.extsi %6 : vector<1x256xi8> to vector<1x256xi32>
    %cst = arith.constant dense<0xFF800000> : vector<256xf32>
    %8 = vector.multi_reduction <maximumf>, %4, %cst [0] : vector<4x256xf32> to vector<256xf32>
    %9 = vector.shape_cast %8 : vector<256xf32> to vector<1x256xf32>
    %10 = vector.broadcast %9 : vector<1x256xf32> to vector<4x256xf32>
    %11 = arith.subf %4, %10 : vector<4x256xf32>
    %12 = math.exp %11 : vector<4x256xf32>
    %cst_6 = arith.constant dense<0.000000e+00> : vector<256xf32>
    %13 = vector.multi_reduction <add>, %12, %cst_6 [0] : vector<4x256xf32> to vector<256xf32>
    %14 = vector.shape_cast %13 : vector<256xf32> to vector<1x256xf32>
    %15 = tpu.reciprocal %14 : vector<1x256xf32> -> vector<1x256xf32>
    %16 = vector.broadcast %15 : vector<1x256xf32> to vector<4x256xf32>
    %17 = arith.mulf %12, %16 : vector<4x256xf32>
    %18 = tpu.iota {dimensions = array<i32: 0>} : vector<4x256xi32>
    %19 = vector.broadcast %7 : vector<1x256xi32> to vector<4x256xi32>
    %20 = arith.cmpi eq, %18, %19 : vector<4x256xi32>
    %cst_7 = arith.constant dense<0.000000e+00> : vector<4xf32>
    %21 = vector.multi_reduction <add>, %17, %cst_7 [1] : vector<4x256xf32> to vector<4xf32>
    %22 = vector.shape_cast %21 : vector<4xf32> to vector<4x1xf32>
    %cst_8 = arith.constant 0.000000e+00 : f32
    %23 = vector.broadcast %cst_8 : f32 to vector<4x256xf32>
    %24 = arith.select %20, %17, %23 : vector<4x256xi1>, vector<4x256xf32>
    %cst_9 = arith.constant dense<0.000000e+00> : vector<4xf32>
    %25 = vector.multi_reduction <add>, %24, %cst_9 [1] : vector<4x256xf32> to vector<4xf32>
    %26 = vector.shape_cast %25 : vector<4xf32> to vector<4x1xf32>
    %c0_10 = arith.constant 0 : index
    %c0_11 = arith.constant 0 : index
    %27 = vector.load %arg5[%c0_10, %c0_11] : memref<4x1xf32, #tpu.memory_space<vmem>>, vector<4x1xf32>
    %28 = arith.mulf %26, %27 : vector<4x1xf32>
    %29 = vector.shape_cast %28 : vector<4x1xf32> to vector<1x4x1xf32>
    %cst_12 = arith.constant dense<0.000000e+00> : vector<1xf32>
    %30 = vector.multi_reduction <add>, %29, %cst_12 [1, 2] : vector<1x4x1xf32> to vector<1xf32>
    %31 = vector.shape_cast %30 : vector<1xf32> to vector<1x1x1xf32>
    %32 = vector.extract %31[0, 0, 0] : f32 from vector<1x1x1xf32>
    %c0_13 = arith.constant 0 : index
    %c0_14 = arith.constant 0 : index
    %33 = vector.load %arg4[%c0_13, %c0_14] : memref<4x1xf32, #tpu.memory_space<vmem>>, vector<4x1xf32>
    %34 = arith.mulf %22, %33 : vector<4x1xf32>
    %35 = vector.shape_cast %34 : vector<4x1xf32> to vector<1x4x1xf32>
    %cst_15 = arith.constant dense<0.000000e+00> : vector<1xf32>
    %36 = vector.multi_reduction <add>, %35, %cst_15 [1, 2] : vector<1x4x1xf32> to vector<1xf32>
    %37 = vector.shape_cast %36 : vector<1xf32> to vector<1x1x1xf32>
    %38 = vector.extract %37[0, 0, 0] : f32 from vector<1x1x1xf32>
    %39 = tpu.iota {dimensions = array<i32: 0>} : vector<8x128xi32>
    %c0_i32_16 = arith.constant 0 : i32
    %40 = vector.broadcast %c0_i32_16 : i32 to vector<8x128xi32>
    %41 = arith.cmpi eq, %39, %40 : vector<8x128xi32>
    %c1_i32 = arith.constant 1 : i32
    %42 = vector.broadcast %c1_i32 : i32 to vector<8x128xi32>
    %43 = arith.cmpi eq, %39, %42 : vector<8x128xi32>
    %cst_17 = arith.constant 0.000000e+00 : f32
    %44 = vector.broadcast %38 : f32 to vector<8x128xf32>
    %45 = vector.broadcast %cst_17 : f32 to vector<8x128xf32>
    %46 = arith.select %43, %44, %45 : vector<8x128xi1>, vector<8x128xf32>
    %47 = vector.broadcast %32 : f32 to vector<8x128xf32>
    %48 = arith.select %41, %47, %46 : vector<8x128xi1>, vector<8x128xf32>
    %c0_18 = arith.constant 0 : index
    %c0_19 = arith.constant 0 : index
    %c0_20 = arith.constant 0 : index
    %49 = vector.load %arg6[%c0_18, %c0_19, %c0_20] : memref<1x8x128xf32, #tpu.memory_space<vmem>>, vector<1x8x128xf32>
    %50 = vector.shape_cast %49 : vector<1x8x128xf32> to vector<8x128xf32>
    %51 = arith.addf %50, %48 : vector<8x128xf32>
    %c0_21 = arith.constant 0 : index
    %c0_22 = arith.constant 0 : index
    %c0_23 = arith.constant 0 : index
    %52 = vector.load %arg6[%c0_21, %c0_22, %c0_23] : memref<1x8x128xf32, #tpu.memory_space<vmem>>, vector<1x8x128xf32>
    %53 = vector.shape_cast %52 : vector<1x8x128xf32> to vector<8x128xf32>
    %54 = vector.shape_cast %51 : vector<8x128xf32> to vector<1x8x128xf32>
    tpu.vector_store %arg6[%c0_21, %c0_22, %c0_23], %54 {strides = array<i32>} : memref<1x8x128xf32, #tpu.memory_space<vmem>>, vector<1x8x128xf32>,
    return
  }
  func.func @transform_0(%arg0: i32, %arg1: i32) -> (i32, i32, i32) {
    %c0_i32 = arith.constant 0 : i32
    %c0_i32_0 = arith.constant 0 : i32
    return %arg0, %c0_i32, %arg1 : i32, i32, i32
  }
  func.func @transform_1(%arg0: i32, %arg1: i32) -> (i32, i32, i32) {
    %c0_i32 = arith.constant 0 : i32
    %c0_i32_0 = arith.constant 0 : i32
    return %arg0, %c0_i32, %arg1 : i32, i32, i32
  }
  func.func @transform_2(%arg0: i32, %arg1: i32) -> (i32, i32) {
    %c0_i32 = arith.constant 0 : i32
    %c0_i32_0 = arith.constant 0 : i32
    %c0_i32_1 = arith.constant 0 : i32
    return %c0_i32, %c0_i32_0 : i32, i32
  }
  func.func @transform_3(%arg0: i32, %arg1: i32) -> (i32, i32) {
    %c0_i32 = arith.constant 0 : i32
    %c0_i32_0 = arith.constant 0 : i32
    %c0_i32_1 = arith.constant 0 : i32
    return %c0_i32, %c0_i32_0 : i32, i32
  }
  func.func @transform_4(%arg0: i32, %arg1: i32) -> (i32, i32, i32) {
    %c0_i32 = arith.constant 0 : i32
    %c0_i32_0 = arith.constant 0 : i32
    %c0_i32_1 = arith.constant 0 : i32
    return %arg0, %c0_i32, %c0_i32_0 : i32, i32, i32
  }
}

</mosaic_0001>

<bundles_post_ra>
// kernel: tpu_custom_call.1
= control target key start
LH: loop header
LB: loop body
LE: loop exit
PB: predicated region body
PF: predicated region fallthrough
CT: control target
= control target key end

     0   :  { %9 = vsyncpa [#allocation3], 0  ;;  %s798_s0 = inlined_call_operand.vmem [shape: f32[2,4,256], index: 0, kind: input, shape index: {}]   ;;  %s799_s1 = inlined_call_operand.vmem [shape: s8[2,1,256], index: 1, kind: input, shape index: {}]   ;;  %s800_s2 = inlined_call_operand.vmem [shape: f32[4,1], index: 2, kind: input, shape index: {}]   ;;  %s801_s3 = inlined_call_operand.vmem [shape: f32[4,1], index: 3, kind: input, shape index: {}]   ;;  %s802_s4 = inlined_call_operand.hbm [shape: f32[2,8,128], index: 4, kind: output, shape index: {}]  }
   0x1   :  { %11 = vsyncpa [#allocation3 + $0x1], 0  ;;  %s670_s15 = smov 0   ;;  %s672_s16 = smov 0  }
   0x2   :  { %s674_s17 = smov 0   ;;  %s676_s18 = smov 0  }
   0x3   :  { %s678_s19 = smov 0   ;;  %s680_s20 = smov 0  }
   0x4 LB: > { %s485_s21 = sadd.s32 4294967295, %s642_s20   ;;  %s486_s22 = sadd.s32 4294967294, %s642_s20   ;;  %s642_s20 = sphi %s680_s20, %s17_s20   ;;  %s638_s19 = sphi %s678_s19, %s809_s19   ;;  %s634_s18 = sphi %s676_s18, %s808_s18   ;;  %s630_s17 = sphi %s674_s17, %s807_s17   ;;  %s626_s16 = sphi %s672_s16, %s806_s16   ;;  %s622_s15 = sphi %s670_s15, %s805_s15  }
   0x5   : > { %s29_s23 = sadd.s32 1, %s638_s19  ;;  %s134_s24 = sadd.s32 1, %s630_s17 }
   0x6   : > { %p31_p0 = scmp.ge.s32.totalorder %s29_s23, 2  ;;  %p144_p1 = scmp.ne.s32.totalorder %s630_s17, %s626_s16 }
   0x7   : > { %p145_p2 = scmp.eq.s32.totalorder %s485_s21, 1  ;;  %p150_p3 = scmp.ne.s32.totalorder %s626_s16, %s622_s15 }
   0x8   : > { %s811_s23 = smov (%p31_p0, %s29_s23), 0  ;;  %p151_p5 = scmp.eq.s32.totalorder %s486_s22, 1 }
   0x9   : > { %p710_p4 = por %p145_p2, %p144_p1  ;;  %s131_s26 = ssub.s32 %s638_s19, %s811_s23 }
   0xa   : > { %p489_p6 = scmp.ge.s32.totalorder %s642_s20, 1  ;;  %p132_p7 = scmp.eq.s32.totalorder %s131_s26, 0 }
   0xb   : > { %p717_p8 = por %p151_p5, %p150_p3  ;;  %p200_p9 = scmp.lt.s32.totalorder %s642_s20, 3 }
   0xc   : > { %s723_s28 = scalar_select %p132_p7, %s630_s17, %s134_s24  }
   0xd   : > { %p201_p10 = pnand %p489_p6, %p200_p9 }
   0xe   : > { %p239_p11 = scmp.lt.s32.totalorder (!%p201_p10), %s634_s18, 1  ;;  %s235_s22 = sand.u32 (!%p201_p10), 1, %s626_s16  }
   0xf   : > { %204 = sbr.rel (%p201_p10) target bundleno = 463 (0x1cf), region = 36  ;;  %s490_s24 = sshll.u32 (!%p201_p10), %s235_s22, 3 }
  0x10   : > { %s237_s5 = scalar_lea.vmem (!%p201_p10), [#allocation2], %s490_s24  ;;  %s384_s10 = scalar_lea.sflag (!%p201_p10), [#allocation3], %s235_s22 }
  0x11   : > { %s397_s6 = sshll.u32 (!%p201_p10), %s237_s5, 4  ;;  %s644_s12 = smov (!%p201_p10), [#allocation2]   ;;  %s398_s6 = int_to_ptr.vmem [resolvable:$true] %s397_s6 }
  0x12   : > { %s570_s13 = sshll.u32 (!%p201_p10), %s644_s12, 4  ;;  %s571_s13 = int_to_ptr.vmem [resolvable:$false] %s570_s13 }
  0x13   : > { %p573_p1 = scmp.lt.s32.totalorder (!%p201_p10), %s398_s6, %s571_s13 }
  0x14   : > { %s727_s29 = scalar_select %p239_p11, %s634_s18, 1  ;;  %vm268_vm0 = vcmask 1043456   ;;  %v314_v32 = vlaneseq  ;;  %v349_v59 = vld [vmem:[%s801_s3] sm:$0xf]  ;;  %vm351_vm3 = vcmask 3072  }
  0x15   : > { %v362_v60 = vld [vmem:[%s800_s2] sm:$0xf] }
  0x16   : > { %s498_s30 = sshll.u32 %s727_s29, 3  ;;  %s493_s8 = sshll.u32 %s727_s29, 1  ;;  %v741_v36 = vshrl.u32 %v314_v32, 7 }
  0x17   : > { %s246_s7 = scalar_lea.vmem %s798_s0, %s498_s30  ;;  %s255_s11 = scalar_lea.vmem %s799_s1, %s493_s8 }
  0x18   : > { %v262_v0 = vld [vmem:[%s246_s7] sm:$0xff]  ;;  %v318_v39 = vsub.s32 0, %v741_v36  ;;  %v322_v40 = vsub.s32 4, %v741_v36  ;;  %vm375_vm4 = vcmp.eq.s32.totalorder %v741_v36, 1  ;;  %vm374_vm5 = vcmp.eq.s32.totalorder %v741_v36, 0  ;;  %s495_s30 = sshll.u32 %s634_s18, 7 }
  0x19   : > { %v266_v1 = vcombine.high %v262_v0, %v262_v0  ;;  %v269_v2 = vsel %vm268_vm0, %v262_v0, -inf  ;;  %v263_v37 = vld [vmem:[%s255_s11] sm:$0x3]  ;;  %s395_s9 = scalar_lea.hbm %s802_s4, %s495_s30  ;;  %s566_s11 = scalar_lea.vmem %s398_s6, 128 }
  0x1a   : > { %v270_v3 = vrot.slane %v269_v2, 4  ;;  %v264_v38 = vunpack.c.0.s8 %v263_v37  ;;  %p567_p12 = scmp.ne.s32.totalorder %s398_s6, %s566_s11  ;;  %s572_s18 = scalar_lea.vmem %s571_s13, 256 }
  0x1b   : > { %v276_v4 = vsel %vm268_vm0, %v266_v1, -inf  ;;  %p574_p2 = scmp.lt.s32.totalorder %s572_s18, %s566_s11 }
  0x1c   : > { %v271_v5 = vmax.f32 %v269_v2, %v270_v3  ;;  %v277_v6 = vrot.slane %v276_v4, 4  ;;  %v319_v41 = vrot.slane %v264_v38, %v318_v39  ;;  %v323_v42 = vrot.slane %v264_v38, %v322_v40  ;;  %p568_p13 = pnand %p567_p12, %p710_p4 }
  0x1d   : > { %p575_p3 = por %p574_p2, %p573_p1 }
  0x1e   : > { %v272_v7 = vrot.slane %v271_v5, 2  ;;  %v278_v8 = vmax.f32 %v276_v4, %v277_v6  ;;  %v327_v44 = vrot.slane %v319_v41, %v318_v39  ;;  %v331_v46 = vrot.slane %v323_v42, %v318_v39  ;;  %p569_p0 = pneg %p568_p13 }
  0x20   : > { %v273_v9 = vmax.f32 %v271_v5, %v272_v7  ;;  %v279_v10 = vrot.slane %v278_v8, 2  ;;  %vm332_vm1 = vcmp.eq.s32.totalorder %v741_v36, %v327_v44  ;;  %vm333_vm2 = vcmp.eq.s32.totalorder %v741_v36, %v331_v46  ;;  %p576_p5 = pnand %p575_p3, %p569_p0 }
  0x22   : > { %v274_v11 = vrot.slane %v273_v9, 1  ;;  %v280_v12 = vmax.f32 %v278_v8, %v279_v10 }
  0x24   : > { %v275_v13 = vmax.f32 %v273_v9, %v274_v11  ;;  %v281_v14 = vrot.slane %v280_v12, 1 }
  0x26   : > { %v282_v15 = vmax.f32 %v280_v12, %v281_v14 }
  0x28   : > { %v285_v16 = vcombine.low %v275_v13, %v282_v15 }
  0x2a   : > { %v287_v17 = vsub.f32 %v262_v0, %v285_v16 }
  0x2c   : > { %v288_v18 = vmul.f32 1.442695, %v287_v17 }
  0x2e   : > { %560 = vpow2.f32 %v288_v18 }
  0x3b   : > { %v561_v19 = vpop.eup %560 }
  0x3c   : > { %v291_v20 = vcombine.high %v561_v19, %v561_v19  ;;  %v293_v21 = vsel %vm268_vm0, %v561_v19, 0.0 }
  0x3d   : > { %v294_v22 = vrot.slane %v293_v21, 4 }
  0x3e   : > { %v300_v23 = vsel %vm268_vm0, %v291_v20, 0.0 }
  0x3f   : > { %v295_v24 = vadd.f32 %v294_v22, %v293_v21  ;;  %v301_v25 = vrot.slane %v300_v23, 4 }
  0x41   : > { %v296_v26 = vrot.slane %v295_v24, 2  ;;  %v302_v27 = vadd.f32 %v301_v25, %v300_v23 }
  0x43   : > { %v297_v28 = vadd.f32 %v296_v26, %v295_v24  ;;  %v303_v29 = vrot.slane %v302_v27, 2 }
  0x45   : > { %v298_v30 = vrot.slane %v297_v28, 1  ;;  %v304_v31 = vadd.f32 %v303_v29, %v302_v27 }
  0x47   : > { %v299_v33 = vadd.f32 %v298_v30, %v297_v28  ;;  %v305_v34 = vrot.slane %v304_v31, 1 }
  0x49   : > { %v306_v35 = vadd.f32 %v305_v34, %v304_v31  ;;  %562 = vrcp.f32 %v299_v33 }
  0x4b   : > { %564 = vrcp.f32 %v306_v35 }
  0x56   : > { %v563_v43 = vpop.eup %562 }
  0x58   : > { %v565_v45 = vpop.eup %564 }
  0x59   : > { %v311_v47 = vcombine.low %v563_v43, %v565_v45 }
  0x5b   : > { %v313_v48 = vmul.f32 %v561_v19, %v311_v47 }
  0x5d   : > { %v335_v49 = vcombine.high %v313_v48, %v313_v48  ;;  %v337_v50 = vsel %vm268_vm0, %v313_v48, 0.0  ;;  %v342_v51 = vsel %vm332_vm1, %v313_v48, 0.0 }
  0x5e   : > { %v344_v54 = vsel %vm268_vm0, %v342_v51, 0.0 }
  0x5f   : > { %v338_v52 = vsel %vm268_vm0, %v335_v49, 0.0  ;;  %v343_v53 = vsel %vm333_vm2, %v335_v49, 0.0 }
  0x60   : > { %v339_v55 = vadd.f32 %v338_v52, %v337_v50  ;;  %v345_v56 = vsel %vm268_vm0, %v343_v53, 0.0 }
  0x61   : > { %v346_v57 = vadd.f32 %v345_v56, %v344_v54 }
  0x62   : > { %340 = vadd.xlane.f32.xlu0 %v339_v55 }
  0x66   : > { %347 = vadd.xlane.f32.xlu0 %v346_v57 }
  0xeb   : > { %v341_v58 = vpop.xlane.xlu0 %340 }
  0xec   : > { %v363_v63 = vmul.f32 %v362_v60, %v341_v58 }
  0xee   : > { %v364_v1 = vsel %vm351_vm3, %v363_v63, 0.0 }
  0xef   : > { %v348_v61 = vpop.xlane.xlu0 %347 }
  0xf0   : > { %v350_v62 = vmul.f32 %v349_v59, %v348_v61 }
  0xf2   : > { %v352_v0 = vsel %vm351_vm3, %v350_v62, 0.0 }
  0xf3   : > { %353 = vadd.xlane.f32.xlu1 %v352_v0 }
  0xf7   : > { %365 = vadd.xlane.f32.xlu1 %v364_v1 }
 0x17c   : > { %v354_v2 = vpop.xlane.xlu1 %353 }
 0x17d   : > { %v355_v3 = vrot.slane %v354_v2, 4 }
 0x17f   : > { %v356_v4 = vadd.f32 %v355_v3, %v354_v2 }
 0x180   : > { %v366_v5 = vpop.xlane.xlu1 %365 }
 0x181   : > { %v357_v6 = vrot.slane %v356_v4, 2  ;;  %v367_v7 = vrot.slane %v366_v5, 4 }
 0x183   : > { %v368_v8 = vadd.f32 %v367_v7, %v366_v5  ;;  %v358_v9 = vadd.f32 %v357_v6, %v356_v4 }
 0x185   : > { %v369_v10 = vrot.slane %v368_v8, 2  ;;  %v359_v11 = vrot.slane %v358_v9, 1 }
 0x187   : > { %v370_v12 = vadd.f32 %v369_v10, %v368_v8  ;;  %v360_v13 = vadd.f32 %v359_v11, %v358_v9 }
 0x189   : > { %499 = vpush %v360_v13  ;;  %v371_v14 = vrot.slane %v370_v12, 1 }
 0x18b   : > { %v372_v15 = vadd.f32 %v371_v14, %v370_v12 }
 0x18d   : > { %501 = vpush %v372_v15 }
 0x1ba   : > { %s500_s26 = spop %499 }
 0x1bb   : > { %v378_v17 = vstv %s500_s26 }
 0x1be   : > { %s502_s29 = spop %501 }
 0x1bf   : > { %v376_v16 = vstv %s502_s29 }
 0x1c0   : > { %v377_v18 = vsel %vm375_vm4, %v376_v16, 0.0 }
 0x1c1   : > { %v379_v19 = vsel %vm374_vm5, %v378_v17, %v377_v18 }
 0x1c2   : > { %382 = vst [vmem:[%s237_s5] sm:$0xff] %v379_v19 }
 0x1c3   : > { %579 = shalt.err (!%p576_p5)
}
 0x1c4   : > { %s580_s14 = scalar_lea.hbm %s395_s9, 128  ;;  %s584_s24 = scalar_lea.hbm %s802_s4, 256 }
 0x1c5   : > { %p581_p6 = scmp.ne.s32.totalorder %s395_s9, %s580_s14  ;;  %p585_p10 = scmp.lt.s32.totalorder %s395_s9, %s802_s4 }
 0x1c6   : > { %p586_p11 = scmp.lt.s32.totalorder %s584_s24, %s580_s14 }
 0x1c7   : > { %p582_p7 = pnand %p581_p6, %p710_p4 }
 0x1c8   : > { %p587_p12 = por %p586_p11, %p585_p10 }
 0x1c9   : > { %p583_p9 = pneg %p582_p7 }
 0x1cb   : > { %p588_p13 = pnand %p587_p12, %p583_p9 }
 0x1cd   : > { %591 = shalt.err (!%p588_p13)
}
 0x1ce   : > { %503 = dma.vmem_to_hbm [thread:$0]  (%p710_p4), %s398_s6, 128, %s395_s9, %s384_s10  }
 0x1cf PF: > { %p509_p0 = scmp.ge.s32.totalorder %s642_s20, 2  ;;  %s409_s30 = sand.u32 1, %s622_s15  }
 0x1d0   : > { %s410_s5 = scalar_lea.sflag [#allocation3], %s409_s30 }
 0x1d1   : > { %p506_p1 = pnand %p509_p0, %p717_p8 }
 0x1d3   : > { %p507_p2 = pneg %p506_p1 }
 0x1d5   : > { %617 = dma.done.wait (%p507_p2), %s410_s5, 128  }
 0x1d6   : > { %619 = vsyncadd (%p507_p2), %s410_s5, 4294967168  ;;  %s17_s20 = sadd.s32 1, %s642_s20   ;;  %s805_s15 = smov %s626_s16 }
 0x1d7   : > { %p14_p3 = scmp.ge.s32.totalorder %s17_s20, 4   ;;  %s806_s16 = smov %s630_s17 }
 0x1d8   : > { %s807_s17 = smov %s723_s28  ;;  %s808_s18 = smov %s638_s19 }
 0x1d9   : > { %s809_s19 = smov %s811_s23  ;;  %16 = sbr.rel (!%p14_p3) target bundleno = 4 (0x4), region = 78 }
 0x1de   :  { %415 = vsyncpa [#allocation3], 1 }
 0x1df   :  { %417 = vsyncpa [#allocation3 + $0x1], 1 }

</bundles_post_ra>
